<compile_context>
chip_gen: v7x
topology: tpu7x:2x2x1
jax: 0.10.0
libtpu: 0.0.40
codegen_flags: <defaults>
</compile_context>

<pallas_src>
import jax
import jax.numpy as jnp
from jax.experimental import pallas as pl
from jax.experimental.pallas import tpu as pltpu


def _round_up(x, m):
    return (x + m - 1) // m * m


def mf_kernel(x_ref, w_ref, b_ref, m_ref, o_ref):
    # x_ref: [TB, F] (bf16/f32)   w_ref: [F, E] (bf16/f32, resident)
    # b_ref: [1, E] f32 (resident) m_ref: [TB, E] (bf16/f32)
    # o_ref: [1, TB] f32  (lane-dense output row)
    x = x_ref[...]
    w = w_ref[...]
    # fc_user: user_metadata = x @ W^T + b   (MXU accumulates in f32)
    um = jnp.dot(x, w, preferred_element_type=jnp.float32) + b_ref[...]
    # dropout(eval) == identity
    m = m_ref[...].astype(jnp.float32)
    pred = jnp.sum(um * m, axis=-1)          # [TB] f32
    o_ref[...] = pred[None, :]               # store as lane-dense (1, TB) row


def mf_forward_pallas(x_cat, w_t, bias, movie_latent, *, tile_b=1024,
                      compute_dtype=jnp.bfloat16):
    B, F = x_cat.shape
    E = movie_latent.shape[-1]

    # Batch tile: multiple of 8 (sublane), capped at tile_b (512-2048 range is the
    # sweet spot; sized well under v7x's 64 MiB VMEM even with double buffering).
    tb = min(int(tile_b), _round_up(B, 8))
    Bp = _round_up(B, tb)
    if Bp != B:
        pad = Bp - B
        x_cat = jnp.pad(x_cat, ((0, pad), (0, 0)))
        movie_latent = jnp.pad(movie_latent, ((0, pad), (0, 0)))
    num_tiles = Bp // tb

    # Only HBM-streamed operands go to the (possibly reduced-precision) compute
    # dtype; bias stays f32 and all elementwise math is f32 inside the kernel.
    x_cat = x_cat.astype(compute_dtype)
    w_t = w_t.astype(compute_dtype)
    movie_latent = movie_latent.astype(compute_dtype)
    bias = bias.astype(jnp.float32).reshape(1, E)

    itemsize = jnp.dtype(compute_dtype).itemsize
    tile_bytes = (2 * tb * F * itemsize      # double-buffered x_cat tile
                  + 2 * tb * E * itemsize    # double-buffered movie tile
                  + 2 * tb * 4               # double-buffered output row (f32)
                  + F * E * itemsize         # resident w_t
                  + E * 4)                   # resident bias
    vmem_limit = int(min(64 * 2 ** 20, max(16 * 2 ** 20, 8 * tile_bytes)))

    out = pl.pallas_call(
        mf_kernel,
        out_shape=jax.ShapeDtypeStruct((num_tiles, tb), jnp.float32),
        grid=(num_tiles,),
        in_specs=[
            pl.BlockSpec((tb, F), lambda i: (i, 0)),   # x_cat : streamed per tile
            pl.BlockSpec((F, E), lambda i: (0, 0)),    # w_t   : resident
            pl.BlockSpec((1, E), lambda i: (0, 0)),    # bias  : resident
            pl.BlockSpec((tb, E), lambda i: (i, 0)),   # movie : streamed per tile
        ],
        out_specs=pl.BlockSpec((1, tb), lambda i: (i, 0)),
        compiler_params=pltpu.CompilerParams(
            dimension_semantics=("parallel",),
            vmem_limit_bytes=vmem_limit,
        ),
    )(x_cat, w_t, bias, movie_latent)

    return out.reshape(Bp)[:B]


class MatrixFactorizationParams:
    """Deterministic synthetic parameters mirroring the PyTorch __init__ shapes."""

    def __init__(self, key, n_users, n_movies, n_genders=2, n_ages=7,
                 n_occupations=21, n_zip_codes=100, embedding_dim=32,
                 metadata_dim=8):
        ks = jax.random.split(key, 8)
        self.embedding_dim = embedding_dim
        self.metadata_dim = metadata_dim
        # nn.Embedding default init ~ N(0, 1)
        self.user_embedding = jax.random.normal(ks[0], (n_users, embedding_dim), jnp.float32)
        self.movie_embedding = jax.random.normal(ks[1], (n_movies, embedding_dim), jnp.float32)
        self.gender_embedding = jax.random.normal(ks[2], (n_genders, metadata_dim), jnp.float32)
        self.age_embedding = jax.random.normal(ks[3], (n_ages, metadata_dim), jnp.float32)
        self.occupation_embedding = jax.random.normal(ks[4], (n_occupations, metadata_dim), jnp.float32)
        self.zip_code_embedding = jax.random.normal(ks[5], (n_zip_codes, metadata_dim), jnp.float32)
        # nn.Linear(in=embedding_dim + 4*metadata_dim, out=embedding_dim)
        fan_in = embedding_dim + 4 * metadata_dim
        bound = 1.0 / jnp.sqrt(fan_in)
        self.fc_w = jax.random.uniform(ks[6], (embedding_dim, fan_in), jnp.float32, -bound, bound)
        self.fc_b = jax.random.uniform(ks[7], (embedding_dim,), jnp.float32, -bound, bound)
        # Pre-transpose once (kernel computes x @ W^T as x @ fc_w_t).
        self.fc_w_t = self.fc_w.T                        # [F, E]


def _gather_inputs(params, user_id, movie_id, gender, age, occupation, zip_code):
    user_latent = jnp.take(params.user_embedding, user_id, axis=0)
    movie_latent = jnp.take(params.movie_embedding, movie_id, axis=0)
    gender_latent = jnp.take(params.gender_embedding, gender, axis=0)
    age_latent = jnp.take(params.age_embedding, age, axis=0)
    occupation_latent = jnp.take(params.occupation_embedding, occupation, axis=0)
    zip_code_latent = jnp.take(params.zip_code_embedding, zip_code, axis=0)
    x_cat = jnp.concatenate(
        [user_latent, gender_latent, age_latent, occupation_latent, zip_code_latent],
        axis=-1,
    )  # [B, embedding_dim + 4*metadata_dim]
    return x_cat, movie_latent


def forward(params, user_id, movie_id, gender, age, occupation, zip_code,
            *, tile_b=1024, compute_dtype=jnp.bfloat16):
    # TODO(synk): the small metadata tables (<4 KB total) could be fused into the
    # kernel via scalar-prefetched indices to drop the x_cat HBM round-trip; the
    # gathers/concat are kept in XLA glue here.
    x_cat, movie_latent = _gather_inputs(
        params, user_id, movie_id, gender, age, occupation, zip_code)
    return mf_forward_pallas(x_cat, params.fc_w_t, params.fc_b, movie_latent,
                             tile_b=tile_b, compute_dtype=compute_dtype)  # [B]


def reference_forward(params, user_id, movie_id, gender, age, occupation, zip_code,
                      *, compute_dtype=jnp.float32):
    # Pure-JAX reference; optionally emulates the bf16 cast of streamed operands.
    x_cat, movie_latent = _gather_inputs(
        params, user_id, movie_id, gender, age, occupation, zip_code)
    x = x_cat.astype(compute_dtype).astype(jnp.float32)
    w = params.fc_w_t.astype(compute_dtype).astype(jnp.float32)
    m = movie_latent.astype(compute_dtype).astype(jnp.float32)
    user_metadata = x @ w + params.fc_b
    return jnp.sum(user_metadata * m, axis=-1)


if __name__ == "__main__":
    key = jax.random.PRNGKey(0)
    pkey, ikey = jax.random.split(key)

    n_users, n_movies = 50, 40
    params = MatrixFactorizationParams(pkey, n_users, n_movies)

    def make_inputs(k, batch):
        iks = jax.random.split(k, 6)
        return (jax.random.randint(iks[0], (batch,), 0, n_users),
                jax.random.randint(iks[1], (batch,), 0, n_movies),
                jax.random.randint(iks[2], (batch,), 0, 2),
                jax.random.randint(iks[3], (batch,), 0, 7),
                jax.random.randint(iks[4], (batch,), 0, 21),
                jax.random.randint(iks[5], (batch,), 0, 100))

    # --- small batch, single tile, full-precision path (tight check) ---
    B = 8
    inputs = make_inputs(ikey, B)
    pred = jax.block_until_ready(
        forward(params, *inputs, compute_dtype=jnp.float32))
    ref = reference_forward(params, *inputs, compute_dtype=jnp.float32)
    assert pred.shape == (B,)
    assert jnp.allclose(pred, ref, atol=1e-3, rtol=1e-3), (pred, ref)

    # --- multi-tile gridded path with padding + bf16 streamed operands ---
    B2 = 1000
    k2 = jax.random.fold_in(ikey, 1)
    inputs2 = make_inputs(k2, B2)
    pred_bf16 = jax.block_until_ready(
        forward(params, *inputs2, tile_b=256, compute_dtype=jnp.bfloat16))
    ref_bf16 = reference_forward(params, *inputs2, compute_dtype=jnp.bfloat16)
    assert pred_bf16.shape == (B2,)
    assert jnp.allclose(pred_bf16, ref_bf16, atol=2e-2, rtol=2e-2), (pred_bf16, ref_bf16)

    print("KERNEL_OK")
</pallas_src>

<mosaic_0001>
module attributes {stable_mosaic.version = 11 : i64} {
  func.func @mf_kernel(%arg0: i32, %arg1: memref<8x64xf32, #tpu.memory_space<vmem>>, %arg2: memref<64x32xf32, #tpu.memory_space<vmem>>, %arg3: memref<1x32xf32, #tpu.memory_space<vmem>>, %arg4: memref<8x32xf32, #tpu.memory_space<vmem>>, %arg5: memref<1x8xf32, #tpu.memory_space<vmem>>) attributes {dimension_semantics = [#tpu.dimension_semantics<parallel>], iteration_bounds = array<i64: 1>, scalar_prefetch = 0 : i64, scratch_operands = 0 : i64, tpu.core_type = #tpu.core_type<tc>, window_params = [{transform_indices = @transform_0, window_bounds = array<i64: 8, 64>}, {pipeline_mode = #tpu.pipeline_mode<synchronous>, transform_indices = @transform_1, window_bounds = array<i64: 64, 32>}, {pipeline_mode = #tpu.pipeline_mode<synchronous>, transform_indices = @transform_2, window_bounds = array<i64: 1, 32>}, {transform_indices = @transform_3, window_bounds = array<i64: 8, 32>}, {transform_indices = @transform_4, window_bounds = array<i64: 1, 8>}]} {
    %c0 = arith.constant 0 : index
    %c0_0 = arith.constant 0 : index
    %0 = vector.load %arg1[%c0, %c0_0] : memref<8x64xf32, #tpu.memory_space<vmem>>, vector<8x64xf32>
    %c0_1 = arith.constant 0 : index
    %c0_2 = arith.constant 0 : index
    %1 = vector.load %arg2[%c0_1, %c0_2] : memref<64x32xf32, #tpu.memory_space<vmem>>, vector<64x32xf32>
    %cst = arith.constant dense<0.000000e+00> : vector<8x32xf32>
    %2 = tpu.matmul %0, %1, %cst {dimension_numbers = #tpu.dot_dimension_numbers<[1], [0], [0], [1], [0, 0, 1, 1], [], []>} : vector<8x64xf32>, vector<64x32xf32>, vector<8x32xf32> -> vector<8x32xf32>
    %c0_3 = arith.constant 0 : index
    %c0_4 = arith.constant 0 : index
    %3 = vector.load %arg3[%c0_3, %c0_4] : memref<1x32xf32, #tpu.memory_space<vmem>>, vector<1x32xf32>
    %4 = vector.broadcast %3 : vector<1x32xf32> to vector<8x32xf32>
    %5 = arith.addf %2, %4 : vector<8x32xf32>
    %c0_5 = arith.constant 0 : index
    %c0_6 = arith.constant 0 : index
    %6 = vector.load %arg4[%c0_5, %c0_6] : memref<8x32xf32, #tpu.memory_space<vmem>>, vector<8x32xf32>
    %7 = arith.mulf %5, %6 : vector<8x32xf32>
    %cst_7 = arith.constant dense<0.000000e+00> : vector<8xf32>
    %8 = vector.multi_reduction <add>, %7, %cst_7 [1] : vector<8x32xf32> to vector<8xf32>
    %9 = vector.shape_cast %8 : vector<8xf32> to vector<1x8xf32>
    %c0_8 = arith.constant 0 : index
    %c0_9 = arith.constant 0 : index
    %10 = vector.load %arg5[%c0_8, %c0_9] : memref<1x8xf32, #tpu.memory_space<vmem>>, vector<1x8xf32>
    tpu.vector_store %arg5[%c0_8, %c0_9], %9 {strides = array<i32>} : memref<1x8xf32, #tpu.memory_space<vmem>>, vector<1x8xf32>,
    return
  }
  func.func @transform_0(%arg0: i32) -> (i32, i32) {
    %c0_i32 = arith.constant 0 : i32
    %c0_i32_0 = arith.constant 0 : i32
    return %arg0, %c0_i32 : i32, i32
  }
  func.func @transform_1(%arg0: i32) -> (i32, i32) {
    %c0_i32 = arith.constant 0 : i32
    %c0_i32_0 = arith.constant 0 : i32
    %c0_i32_1 = arith.constant 0 : i32
    return %c0_i32, %c0_i32_0 : i32, i32
  }
  func.func @transform_2(%arg0: i32) -> (i32, i32) {
    %c0_i32 = arith.constant 0 : i32
    %c0_i32_0 = arith.constant 0 : i32
    %c0_i32_1 = arith.constant 0 : i32
    return %c0_i32, %c0_i32_0 : i32, i32
  }
  func.func @transform_3(%arg0: i32) -> (i32, i32) {
    %c0_i32 = arith.constant 0 : i32
    %c0_i32_0 = arith.constant 0 : i32
    return %arg0, %c0_i32 : i32, i32
  }
  func.func @transform_4(%arg0: i32) -> (i32, i32) {
    %c0_i32 = arith.constant 0 : i32
    %c0_i32_0 = arith.constant 0 : i32
    return %arg0, %c0_i32 : i32, i32
  }
}

</mosaic_0001>

<bundles_post_ra>
// kernel: tpu_custom_call.1
= control target key start
LH: loop header
LB: loop body
LE: loop exit
PB: predicated region body
PF: predicated region fallthrough
CT: control target
= control target key end

     0   :  { %v208_v3 = vmov 0.0|0.0   ;;  %vm209_vm0 = vmmov 0   ;;  %v210_v6 = vmov 0.0   ;;  %s282_s0 = inlined_call_operand.vmem [shape: f32[8,64], index: 0, kind: input, shape index: {}]   ;;  %s283_s1 = inlined_call_operand.vmem [shape: f32[64,32], index: 1, kind: input, shape index: {}]   ;;  %s284_s2 = inlined_call_operand.vmem [shape: f32[1,32], index: 2, kind: input, shape index: {}]   ;;  %s285_s3 = inlined_call_operand.vmem [shape: f32[8,32], index: 3, kind: input, shape index: {}]   ;;  %s286_s4 = inlined_call_operand.hbm [shape: f32[1,8], index: 4, kind: output, shape index: {}]  }
   0x1   :  { %v19_v0 = vld [vmem:[%s283_s1] sm:$0xff]  ;;  %v20_v1 = vld [vmem:[%s283_s1 + $0x8] sm:$0xff]  ;;  %v21_v2 = vld [vmem:[%s283_s1 + $0x10] sm:$0xff]  ;;  %168 = vmatprep.subr.bf16.mxu0 %v208_v3  ;;  %165 = vmatprep.mubr.msk.f32.mxu0 %vm209_vm0, %v210_v6 }
   0x2   :  { %v169_v4 = vpack.c.bf16 %v20_v1, %v19_v0  ;;  %v22_v5 = vld [vmem:[%s283_s1 + $0x18] sm:$0xff] }
   0x3   :  { %v172_v7 = vpack.c.bf16 %v22_v5, %v21_v2 }
   0x4   :  { %170 = vmatpush3.bf16.msra.mxu0 %v169_v4 }
   0x5   :  { %9 = vsyncpa [#allocation3], 0  ;;  %171 = vmatprep.subr.bf16.mxu0 %v208_v3  ;;  %v23_v8 = vld [vmem:[%s283_s1 + $0x20] sm:$0xff]  ;;  %v24_v9 = vld [vmem:[%s283_s1 + $0x28] sm:$0xff]  ;;  %vm34_vm1 = vcmask 523264   ;;  %vm110_vm2 = vcmask 261120   ;;  %v115_v22 = vlaneseq }
   0x6   :  { %v175_v10 = vpack.c.bf16 %v24_v9, %v23_v8  ;;  %v25_v11 = vld [vmem:[%s283_s1 + $0x30] sm:$0xff]  ;;  %v26_v12 = vld [vmem:[%s283_s1 + $0x38] sm:$0xff]  ;;  %v18_v14 = vld [vmem:[%s282_s0] sm:$0xff]  ;;  %s211_s0 = smov [#allocation2]   ;;  %vm122_vm3 = vcmask 57344  }
   0x7   :  { %v178_v13 = vpack.c.bf16 %v26_v12, %v25_v11  ;;  %v138_v15 = vld [vmem:[%s284_s2] ss:$0 sm:$0xff]  ;;  %v116_v23 = vand.u32 127, %v115_v22  ;;  %v118_v24 = vshrl.u32 %v115_v22, 7  ;;  %s130_s1 = sshll.u32 %s211_s0, 4  ;;  %s131_s1 = int_to_ptr.vmem [resolvable:$true] %s130_s1 }
   0x8   :  { %173 = vmatpush3.bf16.msra.mxu0 %v172_v7  ;;  %v108_v17 = vld [vmem:[%s285_s3] sm:$0xff]  ;;  %s184_s2 = scalar_lea.vmem %s131_s1, 16  ;;  %s188_s3 = scalar_lea.vmem %s131_s1, 32 }
   0x9   :  { %174 = vmatprep.subr.bf16.mxu0 %v208_v3  ;;  %v119_v25 = vsub.s32 %v116_v23, %v118_v24  ;;  %p185_p0 = scmp.ne.s32.totalorder %s131_s1, %s184_s2  ;;  %p189_p1 = scmp.lt.s32.totalorder %s131_s1, %s131_s1 }
   0xa   :  { %p190_p2 = scmp.lt.s32.totalorder %s188_s3, %s184_s2 }
   0xc   :  { %176 = vmatpush3.bf16.msra.mxu0 %v175_v10  ;;  %p191_p3 = por %p190_p2, %p189_p1 }
   0xd   :  { %177 = vmatprep.subr.bf16.mxu0 %v208_v3 }
   0xe   :  { %p192_p4 = pnand %p191_p3, %p185_p0 }
  0x10   :  { %179 = vmatpush3.bf16.msra.mxu0 %v178_v13 }
  0x13   :  { %166 = vmatmul.mubr.msk.f32.vlgmr.msra.gmra.mrb[0].mxu0 %vm34_vm1, %v18_v14 }
  0xe6   :  { %v104_v16 = vpop.f32.mrb[0].mxu0 }
  0xe7   :  { %v105_v18 = vadd.f32 %v138_v15, %v104_v16  ;;  %v167_v19 = vpop.f32.mrb[1].mxu0 }
  0xe9   :  { %v109_v20 = vmul.f32 %v108_v17, %v105_v18 }
  0xeb   :  { %v111_v21 = vsel %vm110_vm2, %v109_v20, 0.0 }
  0xec   :  { %112 = vadd.xlane.f32.xlu0 %v111_v21 }
 0x179   :  { %v113_v26 = vpop.xlane.xlu0 %112 }
 0x17a   :  { %v120_v27 = vrot.slane %v113_v26, %v119_v25 }
 0x17c   :  { %123 = vst.msk [vmem:[#allocation2] sm:$0x1] %vm122_vm3, %v120_v27 }
 0x17d   :  { %195 = shalt.err (!%p192_p4)
}
 0x17e   :  { %s196_s13 = scalar_lea.hbm %s286_s4, 16 }
 0x17f   :  { %p197_p5 = scmp.ne.s32.totalorder %s286_s4, %s196_s13  ;;  %p200_p6 = scmp.lt.u32.totalorder %s196_s13, %s286_s4 }
 0x181   :  { %p202_p7 = pnand %p200_p6, %p197_p5 }
 0x183   :  { %205 = shalt.err (!%p202_p7)
}
 0x184   :  { %133 = dma.vmem_to_hbm [thread:$0]  %s131_s1, 16, %s286_s4, [#allocation3]  }
 0x185   :  { %206 = dma.done.wait [#allocation3], 16  }
 0x186   :  { %207 = vsyncadd [#allocation3], 4294967280 }
 0x187   :  { %137 = vsyncpa [#allocation3], 1 }

</bundles_post_ra>
